<compile_context>
chip_gen: v5e
topology: v5e:2x2
jax: 0.10.0
libtpu: 0.0.40
codegen_flags: <defaults>
</compile_context>

<pallas_src>
import functools

import jax
import jax.numpy as jnp
from jax.experimental import pallas as pl
from jax.experimental.pallas import tpu as pltpu


# ----------------------------------------------------------------------------
# Minimal module system (stand-in for torch.nn.Module so _parse_search_space
# can walk `_modules` exactly like the PyTorch original).
# ----------------------------------------------------------------------------
class Module:
    def __init__(self):
        self.__dict__.setdefault("_modules", {})

    def add_module(self, name, module):
        self._modules[name] = module
        super().__setattr__(name, module)


class Mutable(Module):
    def __init__(self, key):
        super().__init__()
        self.key = key
        self.name = None
        self._mutator = None

    def set_mutator(self, mutator):
        self._mutator = mutator


class MutableScope(Mutable):
    pass


class OperationSpace(Mutable):
    """Holds a list of candidate ops; forward delegates to the mutator."""

    def __init__(self, ops, key):
        super().__init__(key)
        self.ops = list(ops)

    def __call__(self, x):
        out, mask = self._mutator.on_forward_operation_space(self, x)
        return out, mask


# ----------------------------------------------------------------------------
# StructuredMutableTreeNode — verbatim port of the reference.
# ----------------------------------------------------------------------------
class StructuredMutableTreeNode:
    def __init__(self, mutable):
        self.mutable = mutable
        self.children = []

    def add_child(self, mutable):
        self.children.append(StructuredMutableTreeNode(mutable))
        return self.children[-1]

    def type(self):
        return type(self.mutable)

    def __iter__(self):
        return self.traverse()

    def traverse(self, order='pre', deduplicate=True, memo=None):
        if memo is None:
            memo = set()
        assert order in ['pre', 'post']
        if order == 'pre':
            if self.mutable is not None:
                if not deduplicate or self.mutable.key not in memo:
                    memo.add(self.mutable.key)
                    yield self.mutable
        for child in self.children:
            for m in child.traverse(order=order, deduplicate=deduplicate, memo=memo):
                yield m
        if order == 'post':
            if self.mutable is not None:
                if not deduplicate or self.mutable.key not in memo:
                    memo.add(self.mutable.key)
                    yield self.mutable


# ----------------------------------------------------------------------------
# BaseMutator — structural behaviour reproduced exactly.
# ----------------------------------------------------------------------------
class BaseMutator(Module):
    def __init__(self, model):
        super().__init__()
        self.__dict__['model'] = model
        self._structured_mutables = self._parse_search_space(self.model)

    def _parse_search_space(self, module, root=None, prefix='', memo=None,
                            nested_detection=None):
        if memo is None:
            memo = set()
        if root is None:
            root = StructuredMutableTreeNode(None)
        if module not in memo:
            memo.add(module)
            if isinstance(module, Mutable):
                if nested_detection is not None:
                    raise RuntimeError(
                        'Cannot have nested search space. Error at {} in {}'.format(
                            module, nested_detection))
                module.name = prefix
                module.set_mutator(self)
                root = root.add_child(module)
                if not isinstance(module, MutableScope):
                    nested_detection = module
            for name, submodule in module._modules.items():
                if submodule is None:
                    continue
                submodule_prefix = prefix + ('.' if prefix else '') + name
                self._parse_search_space(submodule, root, submodule_prefix,
                                         memo=memo,
                                         nested_detection=nested_detection)
        return root

    @property
    def mutables(self):
        return self._structured_mutables

    def forward(self, *inputs):
        raise RuntimeError('Forward is undefined for mutators.')

    def __setattr__(self, name, value):
        if name == 'model':
            raise AttributeError(
                "Attribute `model` can be set at most once, and you shouldn't use "
                "`self.model = model` to include you network, as it will include all "
                "parameters in model into the mutator.")
        return super().__setattr__(name, value)

    def enter_mutable_scope(self, mutable_scope):
        pass

    def exit_mutable_scope(self, mutable_scope):
        pass

    def on_forward_operation_space(self, mutable, *inputs):
        raise NotImplementedError

    def on_forward_input_space(self, mutable, tensor_list):
        raise NotImplementedError

    def export(self):
        raise NotImplementedError


# ----------------------------------------------------------------------------
# Fused Pallas kernel: read one tile of x, apply every (elementwise) candidate
# op on-chip, weighted-accumulate, write one tile of the result.
#   w   : [K]            architecture weights / mask (scalar-prefetched, SMEM)
#   x   : [tile_r, lane] lane-dense input tile (VMEM)
#   out : [tile_r, lane] out = sum_k w[k] * ops[k](x)
# ----------------------------------------------------------------------------
def _fused_select_kernel(ops, compute_dtype, w_ref, x_ref, out_ref):
    x = x_ref[...].astype(compute_dtype)
    acc = w_ref[0].astype(compute_dtype) * ops[0](x)
    for k in range(1, len(ops)):          # K is tiny and static -> unrolled
        acc = acc + w_ref[k].astype(compute_dtype) * ops[k](x)
    out_ref[...] = acc.astype(out_ref.dtype)


def _pick_lane(total):
    """Lane width (multiple of 128): prefer one that makes rows a multiple of 8,
    else one that divides total exactly (no pad), else 128 (tiny pad)."""
    for lane in (2048, 1024, 512, 256, 128):
        if total % lane == 0 and (total // lane) % 8 == 0:
            return lane
    for lane in (2048, 1024, 512, 256, 128):
        if total % lane == 0:
            return lane
    return 128


@functools.lru_cache(maxsize=None)
def _tile_budgets():
    """Per-generation (max_block_bytes, vmem_limit_bytes)."""
    try:
        cap = int(getattr(pltpu.get_tpu_info(), "vmem_capacity_bytes", 0) or 0)
    except Exception:
        cap = 0
    if cap >= 100 * 1024 * 1024:
        # v5e / v6e: 128 MiB physical VMEM -> bigger blocks, fewer grid steps.
        return 8 * 1024 * 1024, 64 * 1024 * 1024
    # v7x (64 MiB physical) or unknown: stay safely inside the smaller VMEM.
    # Double-buffered in+out ~= 4x block = 16 MiB << 48 MiB limit.
    return 4 * 1024 * 1024, 48 * 1024 * 1024


def pallas_fused_op_select(x, weights, *, ops, max_block_bytes=None,
                           vmem_limit_bytes=None):
    """Compute sum_k weights[k] * ops[k](x) in one HBM pass (any input shape).

    ops must be elementwise: each candidate is applied independently per
    repacked [tile_rows, lane] tile.
    """
    # TODO(synk): non-elementwise candidate ops (convs, softmax over features,
    # etc.) would need the stacked [K, B, N] weighted-sum path instead of
    # in-kernel fusion; they would silently compute the wrong answer here.
    if max_block_bytes is None or vmem_limit_bytes is None:
        mb, vl = _tile_budgets()
        max_block_bytes = max_block_bytes or mb
        vmem_limit_bytes = vmem_limit_bytes or vl

    orig_shape, orig_dtype = x.shape, x.dtype
    itemsize = jnp.dtype(orig_dtype).itemsize
    # f32 inputs accumulate in f32; sub-f32 (bf16) stays native (bf16 VPU/EUP
    # on v6e/v7x -> 2x elements per vreg / byte of VMEM).
    # TODO(synk): on v5e (no bf16 VPU/EUP) sub-f32 inputs should upcast to f32.
    compute_dtype = jnp.float32 if itemsize >= 4 else orig_dtype

    flat = x.reshape(-1)
    total = flat.shape[0]

    # Repack to a lane-dense [rows, lane] slab so vreg loads/stores are
    # full-width.  Pad only when no lane width divides total (pad < lane).
    lane = _pick_lane(total)
    pad = (-total) % lane
    if pad:
        flat = jnp.pad(flat, (0, pad))     # padded zeros are finite under the ops
    rows = (total + pad) // lane
    x2d = flat.reshape(rows, lane)

    if rows <= 8:
        tile_rows = rows                   # full-extent block (allowed for any size)
    else:
        budget_rows = max(8, (max_block_bytes // (lane * itemsize)) // 8 * 8)
        tile_rows = min(budget_rows, (rows // 8) * 8)
        # Keep >=2 grid blocks when rows permit so v7x's 2 TensorCores both
        # get work (dimension_semantics="parallel"); neutral on v5e/v6e.
        half = ((rows // 2) // 8) * 8
        if half >= 8:
            tile_rows = min(tile_rows, half)

    grid = (pl.cdiv(rows, tile_rows),)     # ragged last block handled by Pallas
    kernel = functools.partial(_fused_select_kernel, tuple(ops), compute_dtype)

    out2d = pl.pallas_call(
        kernel,
        out_shape=jax.ShapeDtypeStruct((rows, lane), orig_dtype),
        grid_spec=pltpu.PrefetchScalarGridSpec(
            num_scalar_prefetch=1,          # weights -> SMEM once, before the grid
            grid=grid,
            in_specs=[pl.BlockSpec((tile_rows, lane), lambda i, w: (i, 0))],
            out_specs=pl.BlockSpec((tile_rows, lane), lambda i, w: (i, 0)),
        ),
        compiler_params=pltpu.CompilerParams(
            dimension_semantics=("parallel",),   # independent tiles -> 2 TCs on v7x
            vmem_limit_bytes=vmem_limit_bytes,
        ),
    )(weights, x2d)

    out_flat = out2d.reshape(-1)
    if pad:
        out_flat = out_flat[:total]
    return out_flat.reshape(orig_shape)


# ----------------------------------------------------------------------------
# Concrete mutator using the fused Pallas kernel for OperationSpace selection.
# ----------------------------------------------------------------------------
class PallasMutator(BaseMutator):
    def __init__(self, model):
        super().__init__(model)
        # Deterministic architecture weights per OperationSpace (softmax of
        # an arange — synthetic, no checkpoint), plus a jitted fused forward
        # per space so the wrapper plumbing fuses with the pallas_call and
        # dispatches once.
        arch, fused = {}, {}
        for m in self.mutables:
            if isinstance(m, OperationSpace):
                logits = jnp.arange(len(m.ops), dtype=jnp.float32) * 0.5
                arch[m.key] = jax.nn.softmax(logits)
                fused[m.key] = jax.jit(
                    functools.partial(pallas_fused_op_select, ops=tuple(m.ops)))
        self.__dict__['_arch_weights'] = arch
        self.__dict__['_fused_fns'] = fused

    def on_forward_operation_space(self, mutable, *inputs):
        (x,) = inputs                              # x: [B, N] flattened layout
        weights = self._arch_weights[mutable.key]  # [K]
        # Candidate ops are elementwise, so they are fused into the kernel:
        # x is read once from HBM and the weighted sum written once.
        out = self._fused_fns[mutable.key](x, weights)
        return out, weights

    def on_forward_input_space(self, mutable, tensor_list):
        # TODO(synk): InputSpace selection not exercised here; same kernel would apply.
        raise NotImplementedError

    def export(self):
        return {k: jnp.argmax(v) for k, v in self._arch_weights.items()}


# ----------------------------------------------------------------------------
# Demo model: one OperationSpace with 3 candidate elementwise ops.
# ----------------------------------------------------------------------------
class TinySearchModel(Module):
    def __init__(self):
        super().__init__()
        ops = [
            lambda x: x,                 # identity
            lambda x: jax.nn.relu(x),    # relu
            lambda x: 2.0 * x,           # scale
        ]
        self.add_module('op_space', OperationSpace(ops, key='op1'))

    def __call__(self, x_nchw):
        B, C, H, W = x_nchw.shape
        x_flat = x_nchw.reshape(B, C * H * W)      # layout: NCHW -> [B, C*H*W]
        y_flat, mask = self.op_space(x_flat)
        return y_flat.reshape(B, C, H, W), mask


if __name__ == "__main__":
    key = jax.random.PRNGKey(0)
    B, C, H, W = 2, 4, 16, 16
    x = jax.random.normal(key, (B, C, H, W), dtype=jnp.float32)

    model = TinySearchModel()
    mutator = PallasMutator(model)

    # Reproduce exact BaseMutator.forward semantics (undefined -> RuntimeError).
    try:
        mutator.forward(x)
        raise AssertionError("BaseMutator.forward should raise RuntimeError")
    except RuntimeError:
        pass

    # Search-space parsing produced exactly one mutable.
    parsed = list(mutator.mutables)
    assert len(parsed) == 1 and parsed[0].key == 'op1' and parsed[0].name == 'op_space'

    # Run the model; the OperationSpace callback runs the fused Pallas kernel.
    out, mask = model(x)
    out = jax.block_until_ready(out)

    # Reference check in plain JAX.
    w = mutator._arch_weights['op1']
    ref = w[0] * x + w[1] * jax.nn.relu(x) + w[2] * (2.0 * x)
    assert out.shape == (B, C, H, W)
    assert jnp.allclose(out, ref, atol=1e-5, rtol=1e-5)

    print("KERNEL_OK")
</pallas_src>

<mosaic_0001>
module attributes {stable_mosaic.version = 11 : i64} {
  func.func @_fused_select_kernel(%arg0: i32, %arg1: memref<3xf32, #tpu.memory_space<smem>>, %arg2: memref<8x256xf32, #tpu.memory_space<vmem>>, %arg3: memref<8x256xf32, #tpu.memory_space<vmem>>) attributes {dimension_semantics = [#tpu.dimension_semantics<parallel>], iteration_bounds = array<i64: 1>, scalar_prefetch = 1 : i64, scratch_operands = 0 : i64, tpu.core_type = #tpu.core_type<tc>, window_params = [{transform_indices = @transform_0, window_bounds = array<i64: 8, 256>}, {transform_indices = @transform_1, window_bounds = array<i64: 8, 256>}]} {
    %c0 = arith.constant 0 : index
    %c0_0 = arith.constant 0 : index
    %0 = vector.load %arg2[%c0, %c0_0] : memref<8x256xf32, #tpu.memory_space<vmem>>, vector<8x256xf32>
    %c0_1 = arith.constant 0 : index
    %1 = memref.load %arg1[%c0_1] : memref<3xf32, #tpu.memory_space<smem>>
    %2 = vector.broadcast %1 : f32 to vector<8x256xf32>
    %3 = arith.mulf %2, %0 : vector<8x256xf32>
    %c1 = arith.constant 1 : index
    %4 = memref.load %arg1[%c1] : memref<3xf32, #tpu.memory_space<smem>>
    %cst = arith.constant 0.000000e+00 : f32
    %5 = vector.broadcast %cst : f32 to vector<8x256xf32>
    %6 = arith.maximumf %0, %5 : vector<8x256xf32>
    %7 = vector.broadcast %4 : f32 to vector<8x256xf32>
    %8 = arith.mulf %7, %6 : vector<8x256xf32>
    %9 = arith.addf %3, %8 : vector<8x256xf32>
    %c2 = arith.constant 2 : index
    %10 = memref.load %arg1[%c2] : memref<3xf32, #tpu.memory_space<smem>>
    %cst_2 = arith.constant 2.000000e+00 : f32
    %11 = vector.broadcast %cst_2 : f32 to vector<8x256xf32>
    %12 = arith.mulf %11, %0 : vector<8x256xf32>
    %13 = vector.broadcast %10 : f32 to vector<8x256xf32>
    %14 = arith.mulf %13, %12 : vector<8x256xf32>
    %15 = arith.addf %9, %14 : vector<8x256xf32>
    %c0_3 = arith.constant 0 : index
    %c0_4 = arith.constant 0 : index
    %16 = vector.load %arg3[%c0_3, %c0_4] : memref<8x256xf32, #tpu.memory_space<vmem>>, vector<8x256xf32>
    tpu.vector_store %arg3[%c0_3, %c0_4], %15 {strides = array<i32>} : memref<8x256xf32, #tpu.memory_space<vmem>>, vector<8x256xf32>,
    return
  }
  func.func @transform_0(%arg0: i32, %arg1: memref<3xf32, #tpu.memory_space<smem>>) -> (i32, i32) {
    %c0_i32 = arith.constant 0 : i32
    %c0_i32_0 = arith.constant 0 : i32
    return %arg0, %c0_i32 : i32, i32
  }
  func.func @transform_1(%arg0: i32, %arg1: memref<3xf32, #tpu.memory_space<smem>>) -> (i32, i32) {
    %c0_i32 = arith.constant 0 : i32
    %c0_i32_0 = arith.constant 0 : i32
    return %arg0, %c0_i32 : i32, i32
  }
}

</mosaic_0001>

<bundles_post_ra>
// kernel: pallas_fused_op_select.1
= control target key start
LH: loop header
LB: loop body
LE: loop exit
PB: predicated region body
PF: predicated region fallthrough
CT: control target
= control target key end

     0   :  { %s62_s12 = smov [#allocation3]   ;;  %s93_s0 = inlined_call_operand.vmem [shape: f32[3], index: 0, kind: input, shape index: {}]   ;;  %s94_s1 = inlined_call_operand.vmem [shape: f32[8,256], index: 1, kind: input, shape index: {}]   ;;  %s95_s2 = inlined_call_operand.vmem [shape: f32[8,256], index: 2, kind: output, shape index: {}]  }
   0x1   :  { %s8_s11 = sshll.u32 %s93_s0, 4  ;;  %s9_s11 = int_to_ptr.vmem [resolvable:$true] %s8_s11 }
   0x2   :  { %11 = dma.vmem_to_smem %s9_s11, 16, %s62_s12, [#allocation2] }
   0x3   :  { %60 = dma.done.wait [#allocation2], 16 }
   0x4   :  { %61 = vsyncadd [#allocation2], 4294967280 }
   0x5   :  { %14 = sfence }
   0x6   :  { %s19_s13 = sld [smem:[#allocation3]]  ;;  %v17_v0 = vld [vmem:[%s94_s1] sm:$0xff]  ;;  %v18_v1 = vld [vmem:[%s94_s1 + $0x8] sm:$0xff] }
   0x7   :  { %s45_s16 = sld [smem:[#allocation3 + $0x1]]  ;;  %v24_v2 = vmax.f32 %v17_v0, 0.0  ;;  %v25_v3 = vmax.f32 %v18_v1, 0.0  ;;  %v32_v4 = vmul.f32 2.0, %v17_v0  ;;  %v33_v5 = vmul.f32 2.0, %v18_v1 }
   0x8   :  { %s46_s19 = sld [smem:[#allocation3 + $0x2]] }
   0xc   :  { %v20_v6 = vstv %s19_s13 }
   0xd   :  { %v21_v7 = vmul.f32 %v20_v6, %v17_v0  ;;  %v26_v8 = vstv %s45_s16  ;;  %v22_v9 = vmul.f32 %v20_v6, %v18_v1 }
   0xe   :  { %v27_v10 = vmul.f32 %v26_v8, %v24_v2  ;;  %v34_v11 = vstv %s46_s19  ;;  %v28_v12 = vmul.f32 %v26_v8, %v25_v3 }
   0xf   :  { %v35_v13 = vmul.f32 %v34_v11, %v32_v4  ;;  %v36_v14 = vmul.f32 %v34_v11, %v33_v5 }
  0x10   :  { %v29_v15 = vadd.f32 %v27_v10, %v21_v7  ;;  %v30_v16 = vadd.f32 %v28_v12, %v22_v9 }
  0x12   :  { %v37_v17 = vadd.f32 %v35_v13, %v29_v15  ;;  %v38_v18 = vadd.f32 %v36_v14, %v30_v16 }
  0x14   :  { %39 = vst [vmem:[%s95_s2] sm:$0xff] %v37_v17 }
  0x15   :  { %40 = vst [vmem:[%s95_s2 + $0x8] sm:$0xff] %v38_v18 }

</bundles_post_ra>
